<compile_context>
chip_gen: v7x
topology: tpu7x:2x2x1
jax: 0.10.0
libtpu: 0.0.40
codegen_flags: <defaults>
</compile_context>

<pallas_src>
import functools

import jax
import jax.numpy as jnp
from jax.experimental import pallas as pl
from jax.experimental.pallas import tpu as pltpu

LABEL_EMBED = 256
STYLE_EMBED = 256
LRELU_SLOPE = 0.2
EPS = 1e-5
VMEM_LIMIT = 48 << 20          # safe on v7x (64 MiB/TC physical), fine on v5e/v6e


def _round_up(v, m):
    return ((v + m - 1) // m) * m


def _pad_n(n):
    p = _round_up(n, 128)
    if p > 1024:
        p = _round_up(n, 512)
    return p


def _tile_n(np_):
    return np_ if np_ <= 1024 else 512


def _pad_k(k):
    p = _round_up(k, 128)
    if p > 2560:
        p = _round_up(k, 512)
    return p


def _tile_k(kp):
    return kp if kp <= 2560 else 512


# ===========================================================================
# Pallas kernels
# ===========================================================================
def _gmm_kernel(x_ref, w_ref, b_ref, o_ref, *, act):
    """Grouped matmul: o[g,i,j] += x[g,i,k] @ w[g,k,j]; bias + act at last k."""
    k = pl.program_id(3)

    @pl.when(k == 0)
    def _():
        o_ref[...] = jnp.zeros_like(o_ref)

    o_ref[...] += jnp.dot(x_ref[...], w_ref[...],
                          preferred_element_type=jnp.float32)

    @pl.when(k == pl.num_programs(3) - 1)
    def _():
        r = o_ref[...] + b_ref[...]
        if act == "lrelu":
            r = jnp.where(r >= 0, r, LRELU_SLOPE * r)
        elif act == "sigmoid":
            r = 1.0 / (1.0 + jnp.exp(-r))
        o_ref[...] = r


def _colnorm_lrelu_kernel(x_ref, o_ref, *, valid_rows):
    """Normalize each column over its (masked) rows, then LeakyReLU(0.2)."""
    x = x_ref[...]                                     # (Rp, tc) f32
    inv_n = 1.0 / float(valid_rows)
    mean = jnp.sum(x, axis=0, keepdims=True) * inv_n   # padded rows are zero
    d = x - mean
    if valid_rows != x.shape[0]:
        row = jax.lax.broadcasted_iota(jnp.int32, x.shape, 0)
        d = jnp.where(row < valid_rows, d, 0.0)
    var = jnp.sum(d * d, axis=0, keepdims=True) * inv_n
    y = (x - mean) * jax.lax.rsqrt(var + EPS)
    o_ref[...] = jnp.where(y >= 0, y, LRELU_SLOPE * y).astype(o_ref.dtype)


# ===========================================================================
# Kernel wrappers
# ===========================================================================
def grouped_matmul(x, w, b, *, act=None):
    """x: (M,K) shared across groups, or (G,M,K) per-group activations.
    w: (G,Kp,Np) bf16 pre-padded, b: (G,1,Np) f32 pre-padded.
    Returns (G, Mp, Np) f32 (caller slices valid rows/cols)."""
    G, Kp, Np = w.shape
    shared = (x.ndim == 2)
    M, K = (x.shape if shared else x.shape[1:])
    Mp = _round_up(M, 8)
    if Mp > 256:
        tm, Mp = 256, _round_up(M, 256)
    else:
        tm = Mp
    tk, tn = _tile_k(Kp), _tile_n(Np)

    xb = x if x.dtype == jnp.bfloat16 else x.astype(jnp.bfloat16)
    if shared:
        if (M, K) != (Mp, Kp):
            xb = jnp.pad(xb, ((0, Mp - M), (0, Kp - K)))
        x_spec = pl.BlockSpec((tm, tk), lambda g, i, j, k: (i, k))
    else:
        if (M, K) != (Mp, Kp):
            xb = jnp.pad(xb, ((0, 0), (0, Mp - M), (0, Kp - K)))
        x_spec = pl.BlockSpec((None, tm, tk), lambda g, i, j, k: (g, i, k))

    return pl.pallas_call(
        functools.partial(_gmm_kernel, act=act),
        out_shape=jax.ShapeDtypeStruct((G, Mp, Np), jnp.float32),
        grid_spec=pltpu.PrefetchScalarGridSpec(
            num_scalar_prefetch=0,
            grid=(G, Mp // tm, Np // tn, Kp // tk),
            in_specs=[
                x_spec,
                pl.BlockSpec((None, tk, tn), lambda g, i, j, k: (g, k, j)),
                pl.BlockSpec((None, 1, tn), lambda g, i, j, k: (g, 0, j)),
            ],
            out_specs=pl.BlockSpec((None, tm, tn), lambda g, i, j, k: (g, i, j)),
        ),
        compiler_params=pltpu.CompilerParams(
            dimension_semantics=("parallel", "parallel", "parallel", "arbitrary"),
            vmem_limit_bytes=VMEM_LIMIT,
        ),
    )(xb, w, b)


def colnorm_lrelu(x, out_dtype=jnp.bfloat16):
    """x: (Gn, R, C) f32.  Normalize each (g, :, c) column over its R rows
    (channels lane-dense, biased variance like PyTorch norms), LeakyReLU(0.2)."""
    Gn, R, C = x.shape
    Rp = _round_up(R, 8)
    Cp = _round_up(C, 128)
    if Cp <= 512:
        tc = Cp
    else:
        tc, Cp = 256, _round_up(C, 256)
    if (R, C) != (Rp, Cp):
        x = jnp.pad(x, ((0, 0), (0, Rp - R), (0, Cp - C)))
    out = pl.pallas_call(
        functools.partial(_colnorm_lrelu_kernel, valid_rows=R),
        out_shape=jax.ShapeDtypeStruct((Gn, Rp, Cp), out_dtype),
        grid_spec=pltpu.PrefetchScalarGridSpec(
            num_scalar_prefetch=0,
            grid=(Gn, Cp // tc),
            in_specs=[pl.BlockSpec((None, Rp, tc), lambda g, j: (g, 0, j))],
            out_specs=pl.BlockSpec((None, Rp, tc), lambda g, j: (g, 0, j)),
        ),
        compiler_params=pltpu.CompilerParams(
            dimension_semantics=("parallel", "parallel"),
            vmem_limit_bytes=VMEM_LIMIT,
        ),
    )(x)
    return out[:, :R, :C]


# ===========================================================================
# Layer glue (im2col / reshapes in XLA, all compute in Pallas)
# ===========================================================================
def _im2col_nhwc(x, k=3, stride=2, pad=1):
    """x: (B, H, W, C) -> patches (B, Ho*Wo, k*k*C), feature order (kh, kw, c)."""
    B, H, W, C = x.shape
    Ho = (H + 2 * pad - k) // stride + 1
    Wo = (W + 2 * pad - k) // stride + 1
    xp = jnp.pad(x, ((0, 0), (pad, pad), (pad, pad), (0, 0)))
    taps = []
    for di in range(k):
        for dj in range(k):
            taps.append(xp[:, di:di + stride * Ho:stride,
                           dj:dj + stride * Wo:stride, :])
    p = jnp.stack(taps, axis=3)                        # (B, Ho, Wo, k*k, C)
    return p.reshape(B, Ho * Wo, k * k * C), Ho, Wo


def conv_stack(conv_groups, x_nhwc):
    """x_nhwc: (B, H, W, Cin).  Runs the [adv, aux] conv stacks batched (G=2)."""
    B = x_nhwc.shape[0]
    norms = ("instance", "instance", "instance", "batch", "batch")
    feat = None
    for li, (cp, nm) in enumerate(zip(conv_groups, norms)):
        if li == 0:                                    # shared input for both groups
            patches, Ho, Wo = _im2col_nhwc(x_nhwc.astype(jnp.bfloat16))
            M = B * Ho * Wo
            out = grouped_matmul(patches.reshape(M, -1), cp["w"], cp["b"])
        else:
            G, Bg, H, W, C = feat.shape
            patches, Ho, Wo = _im2col_nhwc(feat.reshape(G * Bg, H, W, C))
            M = Bg * Ho * Wo
            out = grouped_matmul(patches.reshape(G, M, -1), cp["w"], cp["b"])
        O = cp["n"]
        out = out[:, :M, :O]                           # (2, B*Ho*Wo, O) f32
        if nm == "instance":                           # per (image, channel) over HW
            rows = colnorm_lrelu(out.reshape(2 * B, Ho * Wo, O))
        else:                                          # batch norm over (B, HW)
            rows = colnorm_lrelu(out.reshape(2, B * Ho * Wo, O))
        feat = rows.reshape(2, B, Ho, Wo, O)           # bf16
    return feat


def embed_blocks_forward(pe, y_cls, y_sty):
    """All 4 embedding streams (adv/aux x label/style) batched per layer."""
    B = y_cls.shape[0]
    k_lab, k_sty = y_cls.shape[1], y_sty.shape[1]
    kmax = max(k_lab, k_sty)
    x0 = jnp.stack([jnp.pad(y_cls.astype(jnp.float32), ((0, 0), (0, kmax - k_lab))),
                    jnp.pad(y_sty.astype(jnp.float32), ((0, 0), (0, kmax - k_sty)))],
                   axis=0)                             # (2, B, kmax)
    n1 = pe["fc1"]["n"]                                # 512 = [adv | aux]
    h = grouped_matmul(x0, pe["fc1"]["w"], pe["fc1"]["b"])[:, :B, :n1]
    half = n1 // 2
    # streams: [adv_label, aux_label, adv_style, aux_style]
    x = jnp.stack([h[0, :, :half], h[0, :, half:],
                   h[1, :, :half], h[1, :, half:]], axis=0)     # (4, B, 256)
    x = grouped_matmul(x, pe["fc2"]["w"], pe["fc2"]["b"])[:, :B, :half]
    # SelfAttentionBlock on a 1x1 map: softmax over a single position is 1, so the
    # block reduces to x + gamma * value(x).
    # TODO(synk): SelfAttentionBlock source not in the snippet; SAGAN-style block
    # with gamma initialized to 0 assumed.
    for att in pe["att"]:
        v = grouped_matmul(x, att["w"], att["b"])[:, :B, :half]
        x = x + att["gamma"][:, None, None] * v
    x = grouped_matmul(x, pe["emb1"]["w"], pe["emb1"]["b"], act="lrelu")[:, :B, :half]
    x = grouped_matmul(x, pe["emb2"]["w"], pe["emb2"]["b"], act="lrelu")[:, :B, :half]
    return x                                           # (4, B, 256) f32


def discriminator_forward(prep, x_nchw, y):
    x = jnp.transpose(x_nchw, (0, 2, 3, 1))            # NCHW -> NHWC once
    feat = conv_stack(prep["conv"], x)                 # (2, B, Hf, Wf, 1024) bf16
    G, B, Hf, Wf, C = feat.shape
    # flatten in PyTorch NCHW order (channel-major) on the tiny final feature map
    flat = feat.transpose(0, 1, 4, 2, 3).reshape(G, B, C * Hf * Wf)
    emb = embed_blocks_forward(prep["embed"], y["cls"], y["cnt_style"])
    emb16 = emb.astype(jnp.bfloat16)
    x_cls = jnp.concatenate([flat, emb16[0:2], emb16[2:4]], axis=2)   # (2, B, F+512)
    cls0, cls1, cls2 = prep["cls"]
    h = grouped_matmul(x_cls, cls0["w"], cls0["b"], act="lrelu")[:, :B, :cls0["n"]]
    h = grouped_matmul(h, cls1["w"], cls1["b"], act="lrelu")[:, :B, :cls1["n"]]
    out = grouped_matmul(h, cls2["w"], cls2["b"], act=None)
    adv = jax.nn.sigmoid(out[0, :B, :1])               # final .sigmoid() (B scalars)
    aux = out[1, :B, :prep["num_classes"]]
    return adv, aux


# ===========================================================================
# One-time weight preparation (pad / transpose / cast — never done per call)
# ===========================================================================
def _prep_linear_group(layers):
    outs = [int(l["W"].shape[0]) for l in layers]
    ins = [int(l["W"].shape[1]) for l in layers]
    n, k = max(outs), max(ins)
    Kp, Np = _pad_k(k), _pad_n(n)
    G = len(layers)
    w = jnp.zeros((G, Kp, Np), jnp.float32)
    b = jnp.zeros((G, 1, Np), jnp.float32)
    for g, l in enumerate(layers):
        og, ig = int(l["W"].shape[0]), int(l["W"].shape[1])
        w = w.at[g, :ig, :og].set(l["W"].T.astype(jnp.float32))
        b = b.at[g, 0, :og].set(l["b"].astype(jnp.float32))
    return {"w": w.astype(jnp.bfloat16), "b": b, "n": n}


def _prep_conv_group(layers):
    O, C, KH, KW = (int(s) for s in layers[0]["W"].shape)
    K = KH * KW * C
    Kp, Np = _pad_k(K), _pad_n(O)
    G = len(layers)
    w = jnp.zeros((G, Kp, Np), jnp.float32)
    b = jnp.zeros((G, 1, Np), jnp.float32)
    for g, l in enumerate(layers):
        w2 = l["W"].transpose(2, 3, 1, 0).reshape(K, O)   # (kh,kw,c) rows = im2col order
        w = w.at[g, :K, :O].set(w2.astype(jnp.float32))
        b = b.at[g, 0, :O].set(l["b"].astype(jnp.float32))
    return {"w": w.astype(jnp.bfloat16), "b": b, "n": O}


def prepare_discriminator(raw, num_classes):
    adv, aux = raw["adv"], raw["aux"]
    adv_convs = [adv["conv_first"]] + adv["backbone"]
    aux_convs = [aux["conv_first"]] + aux["backbone"]
    conv_groups = [_prep_conv_group([a, b]) for a, b in zip(adv_convs, aux_convs)]

    def fc1_concat(kind):                               # concat adv/aux fc1 along N
        W = jnp.concatenate([adv[kind]["fc1"]["W"], aux[kind]["fc1"]["W"]], axis=0)
        bb = jnp.concatenate([adv[kind]["fc1"]["b"], aux[kind]["fc1"]["b"]], axis=0)
        return {"W": W, "b": bb}

    streams = [adv["label"], aux["label"], adv["style"], aux["style"]]
    embed = {
        "fc1": _prep_linear_group([fc1_concat("label"), fc1_concat("style")]),
        "fc2": _prep_linear_group([s["fc2"] for s in streams]),
        "att": [],
        "emb1": _prep_linear_group([s["emb1"] for s in streams]),
        "emb2": _prep_linear_group([s["emb2"] for s in streams]),
    }
    for i in range(3):
        grp = _prep_linear_group([s["att"][i]["value"] for s in streams])
        grp["gamma"] = jnp.stack([s["att"][i]["gamma"] for s in streams])
        embed["att"].append(grp)

    cls = [_prep_linear_group([adv["cls"][i], aux["cls"][i]]) for i in range(3)]
    return {"conv": conv_groups, "embed": embed, "cls": cls,
            "num_classes": int(num_classes)}


# ===========================================================================
# Deterministic parameter initialization (synthetic weights, no checkpoint)
# ===========================================================================
def _init_linear(key, in_f, out_f, scale=0.05):
    kw, kb = jax.random.split(key)
    return {"W": jax.random.normal(kw, (out_f, in_f), jnp.float32) * scale,
            "b": jax.random.normal(kb, (out_f,), jnp.float32) * scale}


def _init_conv(key, in_c, out_c, k=3, scale=0.05):
    kw, kb = jax.random.split(key)
    return {"W": jax.random.normal(kw, (out_c, in_c, k, k), jnp.float32) * scale,
            "b": jax.random.normal(kb, (out_c,), jnp.float32) * scale}


def _init_embed_block(key, in_c, out_c):
    ks = jax.random.split(key, 7)
    return {
        "fc1": _init_linear(ks[0], in_c, out_c),
        "fc2": _init_linear(ks[1], out_c, out_c),
        "att": [{"value": _init_linear(ks[2 + i], out_c, out_c),
                 "gamma": jnp.float32(0.0)} for i in range(3)],
        "emb1": _init_linear(ks[5], out_c, out_c),
        "emb2": _init_linear(ks[6], out_c, out_c),
    }


def _init_classifier(key, in_size, in_channels, num_classes):
    ks = jax.random.split(key, 10)
    flat = 1024 * (in_size // 32) ** 2
    return {
        "conv_first": _init_conv(ks[0], in_channels, 64),
        "backbone": [_init_conv(ks[1], 64, 128), _init_conv(ks[2], 128, 256),
                     _init_conv(ks[3], 256, 512), _init_conv(ks[4], 512, 1024)],
        "label": _init_embed_block(ks[5], 143, LABEL_EMBED),
        "style": _init_embed_block(ks[6], 5, STYLE_EMBED),
        "cls": [_init_linear(ks[7], flat + LABEL_EMBED + STYLE_EMBED, flat // 2),
                _init_linear(ks[8], flat // 2, flat // 4),
                _init_linear(ks[9], flat // 4, num_classes)],
    }


def init_discriminator(key, in_size, in_channels, num_classes):
    ka, kx = jax.random.split(key)
    return {"adv": _init_classifier(ka, in_size, in_channels, 1),
            "aux": _init_classifier(kx, in_size, in_channels, num_classes)}


if __name__ == "__main__":
    key = jax.random.PRNGKey(0)
    kp, kx, k1, k2 = jax.random.split(key, 4)
    B, in_size, in_channels, num_classes = 2, 32, 3, 10

    raw = init_discriminator(kp, in_size, in_channels, num_classes)
    params = prepare_discriminator(raw, num_classes)   # pad/transpose/bf16 ONCE

    x = jax.random.normal(kx, (B, in_channels, in_size, in_size), jnp.float32)
    y = {"cls": jax.random.normal(k1, (B, 143), jnp.float32),
         "cnt_style": jax.random.normal(k2, (B, 5), jnp.float32)}

    adv, aux = discriminator_forward(params, x, y)
    jax.block_until_ready((adv, aux))

    assert adv.shape == (B, 1) and aux.shape == (B, num_classes)
    assert bool(jnp.all((adv >= 0.0) & (adv <= 1.0)))
    print("KERNEL_OK")
</pallas_src>

<mosaic_0001>
module attributes {stable_mosaic.version = 11 : i64} {
  func.func @_gmm_kernel(%arg0: i32, %arg1: i32, %arg2: i32, %arg3: i32, %arg4: memref<256x128xbf16, #tpu.memory_space<vmem>>, %arg5: memref<1x128x128xbf16, #tpu.memory_space<vmem>>, %arg6: memref<1x1x128xf32, #tpu.memory_space<vmem>>, %arg7: memref<1x256x128xf32, #tpu.memory_space<vmem>>) attributes {dimension_semantics = [#tpu.dimension_semantics<parallel>, #tpu.dimension_semantics<parallel>, #tpu.dimension_semantics<parallel>, #tpu.dimension_semantics<arbitrary>], iteration_bounds = array<i64: 2, 2, 1, 1>, scalar_prefetch = 0 : i64, scratch_operands = 0 : i64, tpu.core_type = #tpu.core_type<tc>, window_params = [{transform_indices = @transform_0, window_bounds = array<i64: 256, 128>}, {transform_indices = @transform_1, window_bounds = array<i64: 1, 128, 128>}, {transform_indices = @transform_2, window_bounds = array<i64: 1, 1, 128>}, {transform_indices = @transform_3, window_bounds = array<i64: 1, 256, 128>}]} {
    %c0_i32 = arith.constant 0 : i32
    %0 = arith.cmpi eq, %arg3, %c0_i32 : i32
    %1 = arith.extui %0 : i1 to i32
    %c0_i32_0 = arith.constant 0 : i32
    %2 = arith.cmpi ne, %1, %c0_i32_0 : i32
    scf.if %2 {
      %cst_13 = arith.constant 0.000000e+00 : f32
      %16 = vector.broadcast %cst_13 : f32 to vector<256x128xf32>
      %c0_14 = arith.constant 0 : index
      %c0_15 = arith.constant 0 : index
      %c0_16 = arith.constant 0 : index
      %17 = vector.load %arg7[%c0_14, %c0_15, %c0_16] : memref<1x256x128xf32, #tpu.memory_space<vmem>>, vector<1x256x128xf32>
      %18 = vector.shape_cast %17 : vector<1x256x128xf32> to vector<256x128xf32>
      %19 = vector.shape_cast %16 : vector<256x128xf32> to vector<1x256x128xf32>
      tpu.vector_store %arg7[%c0_14, %c0_15, %c0_16], %19 {strides = array<i32>} : memref<1x256x128xf32, #tpu.memory_space<vmem>>, vector<1x256x128xf32>,
    } else {
    }
    %c0 = arith.constant 0 : index
    %c0_1 = arith.constant 0 : index
    %c0_2 = arith.constant 0 : index
    %3 = vector.load %arg7[%c0, %c0_1, %c0_2] : memref<1x256x128xf32, #tpu.memory_space<vmem>>, vector<1x256x128xf32>
    %4 = vector.shape_cast %3 : vector<1x256x128xf32> to vector<256x128xf32>
    %c0_3 = arith.constant 0 : index
    %c0_4 = arith.constant 0 : index
    %5 = vector.load %arg4[%c0_3, %c0_4] : memref<256x128xbf16, #tpu.memory_space<vmem>>, vector<256x128xbf16>
    %c0_5 = arith.constant 0 : index
    %c0_6 = arith.constant 0 : index
    %c0_7 = arith.constant 0 : index
    %6 = vector.load %arg5[%c0_5, %c0_6, %c0_7] : memref<1x128x128xbf16, #tpu.memory_space<vmem>>, vector<1x128x128xbf16>
    %7 = vector.shape_cast %6 : vector<1x128x128xbf16> to vector<128x128xbf16>
    %cst = arith.constant dense<0.000000e+00> : vector<256x128xf32>
    %8 = tpu.matmul %5, %7, %cst {dimension_numbers = #tpu.dot_dimension_numbers<[1], [0], [0], [1], [0, 0, 1, 1], [], []>} : vector<256x128xbf16>, vector<128x128xbf16>, vector<256x128xf32> -> vector<256x128xf32>
    %9 = arith.addf %4, %8 : vector<256x128xf32>
    %c0_8 = arith.constant 0 : index
    %c0_9 = arith.constant 0 : index
    %c0_10 = arith.constant 0 : index
    %10 = vector.load %arg7[%c0_8, %c0_9, %c0_10] : memref<1x256x128xf32, #tpu.memory_space<vmem>>, vector<1x256x128xf32>
    %11 = vector.shape_cast %10 : vector<1x256x128xf32> to vector<256x128xf32>
    %12 = vector.shape_cast %9 : vector<256x128xf32> to vector<1x256x128xf32>
    tpu.vector_store %arg7[%c0_8, %c0_9, %c0_10], %12 {strides = array<i32>} : memref<1x256x128xf32, #tpu.memory_space<vmem>>, vector<1x256x128xf32>,
    %c0_i32_11 = arith.constant 0 : i32
    %13 = arith.cmpi eq, %arg3, %c0_i32_11 : i32
    %14 = arith.extui %13 : i1 to i32
    %c0_i32_12 = arith.constant 0 : i32
    %15 = arith.cmpi ne, %14, %c0_i32_12 : i32
    scf.if %15 {
      %c0_13 = arith.constant 0 : index
      %c0_14 = arith.constant 0 : index
      %c0_15 = arith.constant 0 : index
      %16 = vector.load %arg7[%c0_13, %c0_14, %c0_15] : memref<1x256x128xf32, #tpu.memory_space<vmem>>, vector<1x256x128xf32>
      %17 = vector.shape_cast %16 : vector<1x256x128xf32> to vector<256x128xf32>
      %c0_16 = arith.constant 0 : index
      %c0_17 = arith.constant 0 : index
      %c0_18 = arith.constant 0 : index
      %18 = vector.load %arg6[%c0_16, %c0_17, %c0_18] : memref<1x1x128xf32, #tpu.memory_space<vmem>>, vector<1x1x128xf32>
      %19 = vector.shape_cast %18 : vector<1x1x128xf32> to vector<1x128xf32>
      %20 = vector.broadcast %19 : vector<1x128xf32> to vector<256x128xf32>
      %21 = arith.addf %17, %20 : vector<256x128xf32>
      %c0_19 = arith.constant 0 : index
      %c0_20 = arith.constant 0 : index
      %c0_21 = arith.constant 0 : index
      %22 = vector.load %arg7[%c0_19, %c0_20, %c0_21] : memref<1x256x128xf32, #tpu.memory_space<vmem>>, vector<1x256x128xf32>
      %23 = vector.shape_cast %22 : vector<1x256x128xf32> to vector<256x128xf32>
      %24 = vector.shape_cast %21 : vector<256x128xf32> to vector<1x256x128xf32>
      tpu.vector_store %arg7[%c0_19, %c0_20, %c0_21], %24 {strides = array<i32>} : memref<1x256x128xf32, #tpu.memory_space<vmem>>, vector<1x256x128xf32>,
    } else {
    }
    return
  }
  func.func @transform_0(%arg0: i32, %arg1: i32, %arg2: i32, %arg3: i32) -> (i32, i32) {
    %c0_i32 = arith.constant 0 : i32
    return %arg1, %arg3 : i32, i32
  }
  func.func @transform_1(%arg0: i32, %arg1: i32, %arg2: i32, %arg3: i32) -> (i32, i32, i32) {
    %c0_i32 = arith.constant 0 : i32
    return %arg0, %arg3, %arg2 : i32, i32, i32
  }
  func.func @transform_2(%arg0: i32, %arg1: i32, %arg2: i32, %arg3: i32) -> (i32, i32, i32) {
    %c0_i32 = arith.constant 0 : i32
    %c0_i32_0 = arith.constant 0 : i32
    return %arg0, %c0_i32, %arg2 : i32, i32, i32
  }
  func.func @transform_3(%arg0: i32, %arg1: i32, %arg2: i32, %arg3: i32) -> (i32, i32, i32) {
    %c0_i32 = arith.constant 0 : i32
    return %arg0, %arg1, %arg2 : i32, i32, i32
  }
}

</mosaic_0001>

<bundles_post_ra>
// kernel: tpu_custom_call.1
= control target key start
LH: loop header
LB: loop body
LE: loop exit
PB: predicated region body
PF: predicated region fallthrough
CT: control target
= control target key end

     0   :  { %s2038_s0 = inlined_call_operand.hbm [shape: bf16[512,128], index: 0, kind: input, shape index: {}]   ;;  %s2039_s1 = inlined_call_operand.hbm [shape: bf16[2,128,128], index: 1, kind: input, shape index: {}]   ;;  %s2040_s2 = inlined_call_operand.vmem [shape: f32[2,1,128], index: 2, kind: input, shape index: {}]   ;;  %s2041_s3 = inlined_call_operand.hbm [shape: f32[2,512,128], index: 3, kind: output, shape index: {}]  }
   0x1   :  { %2055 = sst [smem:[#allocation16_spill]] %s2038_s0 }
   0x2   :  { %8 = vsyncpa [#allocation3], 0 }
   0x3   :  { %10 = vsyncpa [#allocation3 + $0x1], 0 }
   0x4   :  { %11 = vsyncpa [#allocation6], 0 }
   0x5   :  { %13 = vsyncpa [#allocation6 + $0x1], 0 }
   0x6   :  { %14 = vsyncpa [#allocation4], 0 }
   0x7   :  { %16 = vsyncpa [#allocation4 + $0x1], 0  ;;  %s1575_s12 = smov 0   ;;  %s1577_s13 = smov 0  }
   0x8   :  { %s1579_s14 = smov 0   ;;  %s1581_s15 = smov 0  }
   0x9   :  { %s1583_s16 = smov 0   ;;  %s1585_s17 = smov 0  }
   0xa   :  { %s1587_s18 = smov 0   ;;  %s1589_s19 = smov 0  }
   0xb   :  { %s1591_s20 = smov 0   ;;  %s1593_s21 = smov 0  }
   0xc   :  { %s1595_s22 = smov 0   ;;  %s1597_s23 = smov 0  }
   0xd   :  { %s1599_s24 = smov 0   ;;  %s1601_s25 = smov 0  }
   0xe LB: > { %2056 = sst [smem:[#allocation11_spill]] %s1538_s23  ;;  %s44_s26 = sadd.s32 1, %s1538_s23  ;;  %s1546_s25 = sphi %s1601_s25, %s22_s25   ;;  %s1542_s24 = sphi %s1599_s24, %s2088_s24   ;;  %s1538_s23 = sphi %s1597_s23, %s2087_s23   ;;  %s1534_s22 = sphi %s1595_s22, %s2086_s22   ;;  %s1530_s21 = sphi %s1593_s21, %s2085_s21   ;;  %s1526_s20 = sphi %s1591_s20, %s2097_s20   ;;  %s1522_s19 = sphi %s1589_s19, %s2096_s19   ;;  %s1518_s18 = sphi %s1587_s18, %s2095_s18   ;;  %s1514_s17 = sphi %s1585_s17, %s2094_s17   ;;  %s1510_s16 = sphi %s1583_s16, %s2093_s16   ;;  %s1506_s15 = sphi %s1581_s15, %s2092_s15   ;;  %s1502_s14 = sphi %s1579_s14, %s2091_s14   ;;  %s1498_s13 = sphi %s1577_s13, %s2090_s13   ;;  %s1494_s12 = sphi %s1575_s12, %s2089_s12  }
   0xf   : > { %2057 = sst [smem:[#allocation12_spill]] %s1542_s24  ;;  %s2042_s27 = sadd.s32 4294967295, %s1546_s25  }
  0x10   : > { %p1645_p0 = scmp.ge.s32.totalorder %s44_s26, 2  ;;  %p64_p1 = scmp.ne.s32.totalorder %s1526_s20, %s1522_s19 }
  0x11   : > { %p2046_p2 = scmp.eq.s32.totalorder %s1546_s25, 0  ;;  %s57_s29 = sadd.s32 1, %s1526_s20 }
  0x12   : > { %s2099_s26 = smov (%p1645_p0, %s44_s26), 0  ;;  %p70_p3 = scmp.ne.s32.totalorder %s1522_s19, %s1518_s18 }
  0x13   : > { %2059 = sst [smem:[#allocation13_spill]] %s2099_s26  ;;  %s1660_s30 = ssub.s32 %s1538_s23, %s2099_s26 }
  0x14   : > { %p1664_p4 = scmp.eq.s32.totalorder %s2042_s27, 0  ;;  %p55_p5 = scmp.eq.s32.totalorder %s1660_s30, 0 }
  0x15   : > { %p66_p6 = por %p2046_p2, %p64_p1  ;;  %p2045_p8 = scmp.lt.s32.totalorder %s1546_s25, 4 }
  0x16   : > { %s2060_s4 = scalar_select %p1664_p4, 1, 0 }
  0x17   : > { %p1673_p7 = por %p1664_p4, %p70_p3  ;;  %s182_s7 = sand.u32 1, %s1526_s20  }
  0x18   : > { %s1678_s6 = scalar_select %p55_p5, %s1526_s20, %s57_s29  }
  0x19   : > { %s2061_s5 = scalar_select %p1673_p7, 1, 0 }
  0x1a   : > { %2062 = sst [smem:[#allocation14_spill]] %s1678_s6  ;;  %s1045_s8 = sshll.u32 %s182_s7, 7 }
  0x1b   : > { %s1086_s9 = sshll.u32 %s1538_s23, 11  ;;  %s2063_s0 = sld [smem:[#allocation16_spill]] }
  0x1c   : > { %s186_s27 = scalar_lea.vmem [#allocation2], %s1045_s8  ;;  %p1692_p9 = pnand %p2045_p8, %p66_p6 }
  0x1d   : > { %s194_s26 = sshll.u32 %s186_s27, 4  ;;  %s1697_s23 = scalar_lea.sflag [#allocation3], %s182_s7  ;;  %s1688_s26 = int_to_ptr.vmem [resolvable:$true] %s194_s26 }
  0x1e   : > { %p1338_p12 = pneg %p1692_p9 }
  0x21   : > { %s1686_s18 = scalar_lea.hbm %s2063_s0, %s1086_s9  ;;  %s1341_s10 = scalar_lea.hbm %s2063_s0, 4096 }
  0x22   : > { %s1336_s9 = scalar_lea.hbm %s1686_s18, 2048  ;;  %p1342_p3 = scmp.lt.u32.totalorder %s1686_s18, %s2063_s0 }
  0x23   : > { %p1337_p11 = scmp.ne.s32.totalorder %s1686_s18, %s1336_s9  ;;  %p1343_p5 = scmp.lt.u32.totalorder %s1341_s10, %s1336_s9 }
  0x24   : > { %p1345_p8 = scmp.lt.u32.totalorder %s1336_s9, %s1686_s18 }
  0x25   : > { %p1339_p13 = pnand %p1338_p12, %p1337_p11  ;;  %p1344_p6 = por %p1343_p5, %p1342_p3 }
  0x27   : > { %p1340_p1 = pneg %p1339_p13  ;;  %p1346_p2 = por %p1345_p8, %p1344_p6 }
  0x29   : > { %p1347_p10 = pnand %p1346_p2, %p1340_p1 }
  0x2b   : > { %1350 = shalt.err (!%p1347_p10)
}
  0x2c   : > { %s1351_s7 = scalar_lea.vmem %s1688_s26, 2048  ;;  %s1548_s27 = smov [#allocation2]  }
  0x2d   : > { %p1352_p11 = scmp.ne.s32.totalorder %s1688_s26, %s1351_s7  ;;  %s1356_s8 = sshll.u32 %s1548_s27, 4  ;;  %s1357_s8 = int_to_ptr.vmem [resolvable:$false] %s1356_s8 }
  0x2e   : > { %s1358_s6 = scalar_lea.vmem %s1357_s8, 4096  ;;  %p1359_p4 = scmp.lt.s32.totalorder %s1688_s26, %s1357_s8 }
  0x2f   : > { %p1354_p13 = pnand %p1352_p11, %p1338_p12  ;;  %p1360_p3 = scmp.lt.s32.totalorder %s1358_s6, %s1351_s7 }
  0x31   : > { %p1355_p7 = pneg %p1354_p13  ;;  %p1361_p5 = por %p1360_p3, %p1359_p4 }
  0x33   : > { %p1362_p8 = pnand %p1361_p5, %p1355_p7 }
  0x35   : > { %1365 = shalt.err (!%p1362_p8)
}
  0x36   : > { %s2049_s9 = smov 64   ;;  %s2050_s10 = smov 4  }
  0x37   : > { %1185 = dma.hbm_to_vmem [thread:$0]  (!%p1692_p9), %s1686_s18, 2048, %s1688_s26, %s1697_s23, %s2049_s9, %s2049_s9, %s2050_s10  }
  0x38   : > { %s2065_s11 = sadd.s32 4294967295, %s1546_s25   ;;  %p235_p4 = scmp.lt.s32.totalorder %s1546_s25, 5 }
  0x39   : > { %p1730_p2 = scmp.eq.s32.totalorder %s2065_s11, 3  ;;  %p2067_p7 = scmp.ge.s32.totalorder %s1546_s25, 1 }
  0x3a   : > { %s48_s29 = sadd.s32 1, %s1542_s24  ;;  %s1042_s23 = sadd.s32 4294967294, %s1546_s25  }
  0x3b   : > { %p1737_p10 = pnand %p2067_p7, %p235_p4  ;;  %s2101_s29 = smov (!%p1645_p0, %s48_s29), %s1542_s24 }
  0x3c   : > { %s87_s26 = sadd.s32 1, %s1514_s17  ;;  %p50_p9 = scmp.ge.s32.totalorder %s2101_s29, 2 }
  0x3d   : > { %p100_p12 = scmp.ne.s32.totalorder %s1510_s16, %s1506_s15  ;;  %p94_p1 = scmp.ne.s32.totalorder %s1514_s17, %s1510_s16 }
  0x3e   : > { %s145_s18 = sadd.s32 1, %s1502_s14  ;;  %s2103_s29 = smov (%p50_p9, %s2101_s29), 0 }
  0x3f   : > { %2069 = sst [smem:[#allocation15_spill]] %s2103_s29  ;;  %p2070_p6 = scmp.ne.s32.totalorder %s2060_s4, 0 }
  0x40   : > { %p155_p0 = scmp.ne.s32.totalorder %s1502_s14, %s1498_s13  ;;  %s80_s8 = ssub.s32 %s1542_s24, %s2103_s29 }
  0x41   : > { %p1756_p11 = por %p100_p12, %p2070_p6  ;;  %p161_p13 = scmp.ne.s32.totalorder %s1498_s13, %s1494_s12 }
  0x42   : > { %p85_p3 = scmp.eq.s32.totalorder %s80_s8, 0  ;;  %s140_s15 = sor.u32 %s80_s8, %s1660_s30 }
  0x43   : > { %s2071_s28 = scalar_select %p1756_p11, 1, 0 }
  0x44   : > { %p143_p5 = scmp.eq.s32.totalorder %s140_s15, 0  ;;  %p1769_p8 = por %p1730_p2, %p155_p0 }
  0x45   : > { %s1774_s11 = scalar_select %p85_p3, %s1514_s17, %s87_s26  }
  0x46   : > { %s2072_s6 = scalar_select %p1769_p8, 1, 0 }
  0x47   : > { %s1777_s4 = scalar_select %p143_p5, %s1502_s14, %s145_s18  }
  0x48   : > { %p162_p4 = scmp.eq.s32.totalorder %s1042_s23, 3  ;;  %s204_s9 = sand.u32 1, %s1514_s17  }
  0x49   : > { %p2073_p7 = scmp.eq.s32.totalorder %s1546_s25, 0  ;;  %s1048_s10 = sshll.u32 %s204_s9, 6 }
  0x4a   : > { %p1785_p12 = por %p162_p4, %p161_p13  ;;  %s1087_s30 = sshll.u32 %s1542_s24, 10 }
  0x4b   : > { %p96_p9 = por %p94_p1, %p2073_p7  ;;  %s208_s7 = scalar_lea.vmem [#allocation5], %s1048_s10 }
  0x4c   : > { %s2074_s0 = scalar_select %p1785_p12, 1, 0 }
  0x4d   : > { %s218_s8 = sshll.u32 %s208_s7, 4  ;;  %s1793_s26 = scalar_lea.hbm %s2039_s1, %s1087_s30  ;;  %s1795_s8 = int_to_ptr.vmem [resolvable:$true] %s218_s8 }
  0x4e   : > { %p2075_p2 = scmp.lt.s32.totalorder %s1546_s25, 4  ;;  %s1803_s10 = scalar_lea.sflag [#allocation6], %s204_s9 }
  0x4f   : > { %s1366_s18 = scalar_lea.hbm %s1793_s26, 1024  ;;  %s1371_s7 = scalar_lea.hbm %s2039_s1, 2048 }
  0x50   : > { %p1799_p1 = pnand %p2075_p2, %p96_p9  ;;  %p1367_p6 = scmp.ne.s32.totalorder %s1793_s26, %s1366_s18 }
  0x51   : > { %p1372_p5 = scmp.lt.u32.totalorder %s1793_s26, %s2039_s1  ;;  %p1373_p4 = scmp.lt.u32.totalorder %s1371_s7, %s1366_s18 }
  0x52   : > { %p1368_p0 = pneg %p1799_p1  ;;  %p1375_p9 = scmp.lt.u32.totalorder %s1366_s18, %s1793_s26 }
  0x53   : > { %p1374_p7 = por %p1373_p4, %p1372_p5 }
  0x54   : > { %p1369_p13 = pnand %p1368_p0, %p1367_p6 }
  0x55   : > { %p1376_p2 = por %p1375_p9, %p1374_p7 }
  0x56   : > { %p1370_p3 = pneg %p1369_p13 }
  0x58   : > { %p1377_p12 = pnand %p1376_p2, %p1370_p3 }
  0x5a   : > { %1380 = shalt.err (!%p1377_p12)
}
  0x5b   : > { %s1381_s9 = scalar_lea.vmem %s1795_s8, 1024  ;;  %s1551_s29 = smov [#allocation5]  }
  0x5c   : > { %p1382_p6 = scmp.ne.s32.totalorder %s1795_s8, %s1381_s9  ;;  %s1386_s30 = sshll.u32 %s1551_s29, 4  ;;  %s1387_s30 = int_to_ptr.vmem [resolvable:$false] %s1386_s30 }
  0x5d   : > { %s1388_s24 = scalar_lea.vmem %s1387_s30, 2048  ;;  %p1389_p11 = scmp.lt.s32.totalorder %s1795_s8, %s1387_s30 }
  0x5e   : > { %p1384_p13 = pnand %p1382_p6, %p1368_p0  ;;  %p1390_p5 = scmp.lt.s32.totalorder %s1388_s24, %s1381_s9 }
  0x60   : > { %p1385_p8 = pneg %p1384_p13  ;;  %p1391_p4 = por %p1390_p5, %p1389_p11 }
  0x62   : > { %p1392_p7 = pnand %p1391_p4, %p1385_p8 }
  0x64   : > { %1395 = shalt.err (!%p1392_p7)
}
  0x65   : > { %s2077_s18 = smov 4   ;;  %s2078_s7 = smov 64  }
  0x66   : > { %1188 = dma.hbm_to_vmem [thread:$0]  (!%p1799_p1), %s1793_s26, 1024, %s1795_s8, %s1803_s10, %s2078_s7, %s2078_s7, %s2077_s18  }
  0x67   : > { %239 = sbr.rel (%p1737_p10) target bundleno = 404 (0x194), region = 32  ;;  %s241_s15 = sand.u32 (!%p1737_p10), 1, %s1522_s19  }
  0x68   : > { %s1052_s29 = sshll.u32 (!%p1737_p10), %s241_s15, 7  ;;  %s242_s9 = scalar_lea.sflag (!%p1737_p10), [#allocation3], %s241_s15 }
  0x69   : > { %s1837_s30 = scalar_lea.vmem (!%p1737_p10), [#allocation2], %s1052_s29  ;;  %p2079_p11 = scmp.ne.s32.totalorder (!%p1737_p10), %s2061_s5, 0 }
  0x6e   : > { %1481 = dma.done.wait (%p2079_p11), %s242_s9, 2048  }
  0x6f   : > { %1483 = vsyncadd (%p2079_p11), %s242_s9, 4294965248  ;;  %s250_s23 = sand.u32 1, %s1510_s16   ;;  %p2080_p10 = scmp.ne.s32.totalorder %s2071_s28, 0 }
  0x70   : > { %s1053_s24 = sshll.u32 %s250_s23, 6  ;;  %s251_s8 = scalar_lea.sflag [#allocation6], %s250_s23 }
  0x71   : > { %s1844_s26 = scalar_lea.vmem [#allocation5], %s1053_s24 }
  0x72   : > { %1485 = dma.done.wait (%p2080_p10), %s251_s8, 1024  }
  0x73   : > { %1487 = vsyncadd (%p2080_p10), %s251_s8, 4294966272  ;;  %v1312_v0 = vld [vmem:[%s1844_s26] sm:$0xff]   ;;  %v1313_v1 = vld [vmem:[%s1844_s26 + $0x8] sm:$0xff]   ;;  %p290_p8 = scmp.lt.s32.totalorder %s1534_s22, 1  ;;  %s285_s27 = sand.u32 1, %s1498_s13  }
  0x74   : > { %1112 = vmatprep.subr.bf16.mxu0 %v1312_v0  ;;  %1160 = vmatprep.subr.bf16.mxu1 %v1312_v0  ;;  %v1314_v2 = vld [vmem:[%s1844_s26 + $0x10] sm:$0xff]   ;;  %v1315_v3 = vld [vmem:[%s1844_s26 + $0x18] sm:$0xff]   ;;  %v1320_v4 = vld [vmem:[%s1837_s30] sm:$0xff]   ;;  %s1054_s7 = sshll.u32 %s285_s27, 8  ;;  %s1081_s29 = sshll.u32 %s1530_s21, 5 }
  0x75   : > { %1113 = vmatpush3.bf16.msra.mxu0 %v1312_v0  ;;  %1168 = vmatpush3.bf16.msra.mxu1 %v1312_v0  ;;  %v1321_v5 = vld [vmem:[%s1837_s30 + $0x40] sm:$0xff]   ;;  %v1317_v7 = vld [vmem:[%s1844_s26 + $0x28] sm:$0xff]   ;;  %v1318_v8 = vld [vmem:[%s1844_s26 + $0x30] sm:$0xff]   ;;  %s291_s5 = scalar_select %p290_p8, %s1534_s22, 1 }
  0x76   : > { %1114 = vmatprep.subr.bf16.mxu0 %v1313_v1  ;;  %1161 = vmatprep.subr.bf16.mxu1 %v1313_v1  ;;  %v1316_v6 = vld [vmem:[%s1844_s26 + $0x20] sm:$0xff]   ;;  %v1319_v9 = vld [vmem:[%s1844_s26 + $0x38] sm:$0xff]   ;;  %v1322_v10 = vld [vmem:[%s1837_s30 + $0x8] sm:$0xff]   ;;  %s1888_s15 = scalar_lea.vmem [#allocation7], %s1054_s7  ;;  %s1082_s9 = sshll.u32 %s1534_s22, 6 }
  0x77   : > { %1128 = vmatprep.mubr.bf16.mxu0 %v1320_v4  ;;  %1144 = vmatprep.mubr.bf16.mxu1 %v1321_v5  ;;  %v1323_v11 = vld [vmem:[%s1837_s30 + $0x48] sm:$0xff]   ;;  %v1324_v12 = vld [vmem:[%s1837_s30 + $0x10] sm:$0xff]   ;;  %v1326_v14 = vld [vmem:[%s1837_s30 + $0x18] sm:$0xff]   ;;  %s295_s18 = scalar_lea.vmem %s2040_s2, %s291_s5  ;;  %s906_s22 = sshll.u32 %s1888_s15, 4  ;;  %s1950_s22 = int_to_ptr.vmem [resolvable:$true] %s906_s22 }
  0x78   : > { %v1325_v13 = vld [vmem:[%s1837_s30 + $0x50] sm:$0xff]   ;;  %v1327_v15 = vld [vmem:[%s1837_s30 + $0x58] sm:$0xff]   ;;  %v1328_v16 = vld [vmem:[%s1837_s30 + $0x20] sm:$0xff]   ;;  %s1962_s26 = scalar_lea.sflag [#allocation4], %s285_s27  ;;  %s1396_s5 = scalar_lea.vmem %s1950_s22, 4096 }
  0x79   : > { %1115 = vmatpush3.bf16.msra.mxu0 %v1313_v1  ;;  %1169 = vmatpush3.bf16.msra.mxu1 %v1313_v1  ;;  %v1329_v17 = vld [vmem:[%s1837_s30 + $0x60] sm:$0xff]   ;;  %v1330_v18 = vld [vmem:[%s1837_s30 + $0x28] sm:$0xff]   ;;  %v1332_v20 = vld [vmem:[%s1837_s30 + $0x30] sm:$0xff]   ;;  %p1397_p12 = scmp.ne.s32.totalorder %s1950_s22, %s1396_s5  ;;  %p2081_p1 = scmp.ne.s32.totalorder %s2072_s6, 0 }
  0x7a   : > { %1116 = vmatprep.subr.bf16.mxu0 %v1314_v2  ;;  %1162 = vmatprep.subr.bf16.mxu1 %v1314_v2  ;;  %v1331_v19 = vld [vmem:[%s1837_s30 + $0x68] sm:$0xff]   ;;  %v1333_v21 = vld [vmem:[%s1837_s30 + $0x70] sm:$0xff]   ;;  %v1334_v22 = vld [vmem:[%s1837_s30 + $0x38] sm:$0xff]   ;;  %s1552_s28 = smov [#allocation7]  }
  0x7b   : > { %v1335_v23 = vld [vmem:[%s1837_s30 + $0x78] sm:$0xff]   ;;  %v1882_v25 = vld [vmem:[%s295_s18] ss:$0 sm:$0xff]  ;;  %s903_s30 = sadd.s32 %s1082_s9, %s1081_s29  ;;  %p1398_p0 = pnand %p1397_p12, %p2081_p1 }
  0x7c   : > { %s1083_s21 = sshll.u32 %s903_s30, 7  ;;  %s1400_s10 = sshll.u32 %s1552_s28, 4  ;;  %s1401_s10 = int_to_ptr.vmem [resolvable:$false] %s1400_s10 }
  0x7d   : > { %1117 = vmatpush3.bf16.msra.mxu0 %v1314_v2  ;;  %1170 = vmatpush3.bf16.msra.mxu1 %v1314_v2  ;;  %s1948_s8 = scalar_lea.hbm %s2041_s3, %s1083_s21  ;;  %p1399_p3 = pneg %p1398_p0 }
  0x7e   : > { %1118 = vmatprep.subr.bf16.mxu0 %v1315_v3  ;;  %1163 = vmatprep.subr.bf16.mxu1 %v1315_v3  ;;  %s1402_s18 = scalar_lea.vmem %s1401_s10, 8192  ;;  %p1403_p9 = scmp.lt.s32.totalorder %s1950_s22, %s1401_s10 }
  0x7f   : > { %p1404_p2 = scmp.lt.s32.totalorder %s1402_s18, %s1396_s5 }
  0x81   : > { %1119 = vmatpush3.bf16.msra.mxu0 %v1315_v3  ;;  %1171 = vmatpush3.bf16.msra.mxu1 %v1315_v3  ;;  %p1405_p6 = por %p1404_p2, %p1403_p9 }
  0x82   : > { %1120 = vmatprep.subr.bf16.mxu0 %v1316_v6  ;;  %1164 = vmatprep.subr.bf16.mxu1 %v1316_v6 }
  0x83   : > { %p1406_p13 = pnand %p1405_p6, %p1399_p3 }
  0x85   : > { %1121 = vmatpush3.bf16.msra.mxu0 %v1316_v6  ;;  %1172 = vmatpush3.bf16.msra.mxu1 %v1316_v6 }
  0x86   : > { %1122 = vmatprep.subr.bf16.mxu0 %v1317_v7  ;;  %1165 = vmatprep.subr.bf16.mxu1 %v1317_v7 }
  0x89   : > { %1123 = vmatpush3.bf16.msra.mxu0 %v1317_v7  ;;  %1173 = vmatpush3.bf16.msra.mxu1 %v1317_v7 }
  0x8a   : > { %1124 = vmatprep.subr.bf16.mxu0 %v1318_v8  ;;  %1166 = vmatprep.subr.bf16.mxu1 %v1318_v8 }
  0x8d   : > { %1125 = vmatpush3.bf16.msra.mxu0 %v1318_v8  ;;  %1174 = vmatpush3.bf16.msra.mxu1 %v1318_v8 }
  0x8e   : > { %1126 = vmatprep.subr.bf16.mxu0 %v1319_v9  ;;  %1167 = vmatprep.subr.bf16.mxu1 %v1319_v9 }
  0x91   : > { %1127 = vmatpush3.bf16.msra.mxu0 %v1319_v9  ;;  %1175 = vmatpush3.bf16.msra.mxu1 %v1319_v9 }
  0x94   : > { %1129 = vmatmul.mubr.bf16.vlgmr.msra.gmra.mrb[0].mxu0 %v1322_v10  ;;  %1145 = vmatmul.mubr.bf16.vlgmr.msra.gmra.mrb[0].mxu1 %v1323_v11 }
  0x95   : > { %1132 = vmatprep.mubr.bf16.mxu0 %v1324_v12  ;;  %1148 = vmatprep.mubr.bf16.mxu1 %v1325_v13 }
  0x9c   : > { %1133 = vmatmul.mubr.bf16.gmra.mrb[4].mxu0 %v1326_v14  ;;  %1149 = vmatmul.mubr.bf16.gmra.mrb[4].mxu1 %v1327_v15 }
  0x9d   : > { %1136 = vmatprep.mubr.bf16.mxu0 %v1328_v16  ;;  %1152 = vmatprep.mubr.bf16.mxu1 %v1329_v17 }
  0xa4   : > { %1137 = vmatmul.mubr.bf16.gmra.mrb[8].mxu0 %v1330_v18  ;;  %1153 = vmatmul.mubr.bf16.gmra.mrb[8].mxu1 %v1331_v19 }
  0xa5   : > { %1140 = vmatprep.mubr.bf16.mxu0 %v1332_v20  ;;  %1156 = vmatprep.mubr.bf16.mxu1 %v1333_v21 }
  0xac   : > { %1141 = vmatmul.mubr.bf16.gmra.mrb[12].mxu0 %v1334_v22  ;;  %1157 = vmatmul.mubr.bf16.gmra.mrb[12].mxu1 %v1335_v23 }
 0x167   : > { %v1130_v24 = vpop.f32.mrb[0].mxu0  ;;  %v1146_v26 = vpop.f32.mrb[0].mxu1 }
 0x168   : > { %v592_v27 = vpop.f32.mrb[1].mxu0  ;;  %v656_v28 = vpop.f32.mrb[1].mxu1  ;;  %v827_v31 = vadd.f32 %v1130_v24, %v1882_v25  ;;  %v843_v32 = vadd.f32 %v1146_v26, %v1882_v25 }
 0x169   : > { %v1131_v29 = vpop.f32.mrb[2].mxu0  ;;  %v1147_v30 = vpop.f32.mrb[2].mxu1  ;;  %v825_v35 = vadd.f32 %v1882_v25, %v592_v27  ;;  %v841_v36 = vadd.f32 %v1882_v25, %v656_v28 }
 0x16a   : > { %v595_v33 = vpop.f32.mrb[3].mxu0  ;;  %v659_v34 = vpop.f32.mrb[3].mxu1  ;;  %859 = vst [vmem:[%s1888_s15 + $0x10] sm:$0xff] %v827_v31  ;;  %875 = vst [vmem:[%s1888_s15 + $0x90] sm:$0xff] %v843_v32  ;;  %v828_v37 = vadd.f32 %v1131_v29, %v1882_v25  ;;  %v844_v38 = vadd.f32 %v1147_v30, %v1882_v25 }
 0x16b   : > { %857 = vst [vmem:[%s1888_s15] sm:$0xff] %v825_v35  ;;  %873 = vst [vmem:[%s1888_s15 + $0x80] sm:$0xff] %v841_v36  ;;  %v826_v39 = vadd.f32 %v1882_v25, %v595_v33  ;;  %v842_v40 = vadd.f32 %v1882_v25, %v659_v34 }
 0x16c   : > { %860 = vst [vmem:[%s1888_s15 + $0x18] sm:$0xff] %v828_v37  ;;  %876 = vst [vmem:[%s1888_s15 + $0x98] sm:$0xff] %v844_v38 }
 0x16d   : > { %858 = vst [vmem:[%s1888_s15 + $0x8] sm:$0xff] %v826_v39  ;;  %874 = vst [vmem:[%s1888_s15 + $0x88] sm:$0xff] %v842_v40 }
 0x16f   : > { %v1134_v41 = vpop.f32.mrb[4].mxu0  ;;  %v1150_v42 = vpop.f32.mrb[4].mxu1 }
 0x170   : > { %v608_v43 = vpop.f32.mrb[5].mxu0  ;;  %v672_v44 = vpop.f32.mrb[5].mxu1  ;;  %v831_v47 = vadd.f32 %v1134_v41, %v1882_v25  ;;  %v847_v48 = vadd.f32 %v1150_v42, %v1882_v25 }
 0x171   : > { %v1135_v45 = vpop.f32.mrb[6].mxu0  ;;  %v1151_v46 = vpop.f32.mrb[6].mxu1  ;;  %v829_v51 = vadd.f32 %v1882_v25, %v608_v43  ;;  %v845_v52 = vadd.f32 %v1882_v25, %v672_v44 }
 0x172   : > { %v611_v49 = vpop.f32.mrb[7].mxu0  ;;  %v675_v50 = vpop.f32.mrb[7].mxu1  ;;  %863 = vst [vmem:[%s1888_s15 + $0x30] sm:$0xff] %v831_v47  ;;  %879 = vst [vmem:[%s1888_s15 + $0xb0] sm:$0xff] %v847_v48  ;;  %v832_v53 = vadd.f32 %v1135_v45, %v1882_v25  ;;  %v848_v54 = vadd.f32 %v1151_v46, %v1882_v25 }
 0x173   : > { %861 = vst [vmem:[%s1888_s15 + $0x20] sm:$0xff] %v829_v51  ;;  %877 = vst [vmem:[%s1888_s15 + $0xa0] sm:$0xff] %v845_v52  ;;  %v830_v55 = vadd.f32 %v1882_v25, %v611_v49  ;;  %v846_v56 = vadd.f32 %v1882_v25, %v675_v50 }
 0x174   : > { %864 = vst [vmem:[%s1888_s15 + $0x38] sm:$0xff] %v832_v53  ;;  %880 = vst [vmem:[%s1888_s15 + $0xb8] sm:$0xff] %v848_v54 }
 0x175   : > { %862 = vst [vmem:[%s1888_s15 + $0x28] sm:$0xff] %v830_v55  ;;  %878 = vst [vmem:[%s1888_s15 + $0xa8] sm:$0xff] %v846_v56 }
 0x177   : > { %v1138_v57 = vpop.f32.mrb[8].mxu0  ;;  %v1154_v58 = vpop.f32.mrb[8].mxu1 }
 0x178   : > { %v624_v59 = vpop.f32.mrb[9].mxu0  ;;  %v688_v60 = vpop.f32.mrb[9].mxu1  ;;  %v835_v63 = vadd.f32 %v1138_v57, %v1882_v25  ;;  %v851_v0 = vadd.f32 %v1154_v58, %v1882_v25 }
 0x179   : > { %v1139_v61 = vpop.f32.mrb[10].mxu0  ;;  %v1155_v62 = vpop.f32.mrb[10].mxu1  ;;  %v833_v3 = vadd.f32 %v1882_v25, %v624_v59  ;;  %v849_v4 = vadd.f32 %v1882_v25, %v688_v60 }
 0x17a   : > { %v627_v1 = vpop.f32.mrb[11].mxu0  ;;  %v691_v2 = vpop.f32.mrb[11].mxu1  ;;  %867 = vst [vmem:[%s1888_s15 + $0x50] sm:$0xff] %v835_v63  ;;  %883 = vst [vmem:[%s1888_s15 + $0xd0] sm:$0xff] %v851_v0  ;;  %v836_v5 = vadd.f32 %v1139_v61, %v1882_v25  ;;  %v852_v6 = vadd.f32 %v1155_v62, %v1882_v25 }
 0x17b   : > { %865 = vst [vmem:[%s1888_s15 + $0x40] sm:$0xff] %v833_v3  ;;  %881 = vst [vmem:[%s1888_s15 + $0xc0] sm:$0xff] %v849_v4  ;;  %v834_v7 = vadd.f32 %v1882_v25, %v627_v1  ;;  %v850_v8 = vadd.f32 %v1882_v25, %v691_v2 }
 0x17c   : > { %868 = vst [vmem:[%s1888_s15 + $0x58] sm:$0xff] %v836_v5  ;;  %884 = vst [vmem:[%s1888_s15 + $0xd8] sm:$0xff] %v852_v6 }
 0x17d   : > { %866 = vst [vmem:[%s1888_s15 + $0x48] sm:$0xff] %v834_v7  ;;  %882 = vst [vmem:[%s1888_s15 + $0xc8] sm:$0xff] %v850_v8 }
 0x17f   : > { %v1142_v9 = vpop.f32.mrb[12].mxu0  ;;  %v1158_v10 = vpop.f32.mrb[12].mxu1 }
 0x180   : > { %v640_v11 = vpop.f32.mrb[13].mxu0  ;;  %v704_v12 = vpop.f32.mrb[13].mxu1  ;;  %v839_v15 = vadd.f32 %v1142_v9, %v1882_v25  ;;  %v855_v16 = vadd.f32 %v1158_v10, %v1882_v25 }
 0x181   : > { %v1143_v13 = vpop.f32.mrb[14].mxu0  ;;  %v1159_v14 = vpop.f32.mrb[14].mxu1  ;;  %v837_v19 = vadd.f32 %v1882_v25, %v640_v11  ;;  %v853_v20 = vadd.f32 %v1882_v25, %v704_v12 }
 0x182   : > { %v643_v17 = vpop.f32.mrb[15].mxu0  ;;  %v707_v18 = vpop.f32.mrb[15].mxu1  ;;  %871 = vst [vmem:[%s1888_s15 + $0x70] sm:$0xff] %v839_v15  ;;  %887 = vst [vmem:[%s1888_s15 + $0xf0] sm:$0xff] %v855_v16  ;;  %v840_v21 = vadd.f32 %v1143_v13, %v1882_v25  ;;  %v856_v22 = vadd.f32 %v1159_v14, %v1882_v25 }
 0x183   : > { %869 = vst [vmem:[%s1888_s15 + $0x60] sm:$0xff] %v837_v19  ;;  %885 = vst [vmem:[%s1888_s15 + $0xe0] sm:$0xff] %v853_v20  ;;  %v838_v23 = vadd.f32 %v1882_v25, %v643_v17  ;;  %v854_v24 = vadd.f32 %v1882_v25, %v707_v18 }
 0x184   : > { %872 = vst [vmem:[%s1888_s15 + $0x78] sm:$0xff] %v840_v21  ;;  %888 = vst [vmem:[%s1888_s15 + $0xf8] sm:$0xff] %v856_v22 }
 0x185   : > { %870 = vst [vmem:[%s1888_s15 + $0x68] sm:$0xff] %v838_v23  ;;  %886 = vst [vmem:[%s1888_s15 + $0xe8] sm:$0xff] %v854_v24 }
 0x186   : > { %1409 = shalt.err (!%p1406_p13)
}
 0x187   : > { %s1410_s27 = scalar_lea.hbm %s1948_s8, 4096  ;;  %s1414_s29 = scalar_lea.hbm %s2041_s3, 16384 }
 0x188   : > { %p1411_p5 = scmp.ne.s32.totalorder %s1948_s8, %s1410_s27  ;;  %p1415_p11 = scmp.lt.u32.totalorder %s1948_s8, %s2041_s3 }
 0x189   : > { %p1416_p10 = scmp.lt.u32.totalorder %s1414_s29, %s1410_s27  ;;  %p1418_p12 = scmp.lt.u32.totalorder %s1410_s27, %s1948_s8 }
 0x18a   : > { %p1412_p4 = pnand %p1411_p5, %p2081_p1 }
 0x18b   : > { %p1417_p8 = por %p1416_p10, %p1415_p11 }
 0x18c   : > { %p1413_p7 = pneg %p1412_p4 }
 0x18d   : > { %p1419_p0 = por %p1418_p12, %p1417_p8 }
 0x18f   : > { %p1420_p3 = pnand %p1419_p0, %p1413_p7 }
 0x191   : > { %1423 = shalt.err (!%p1420_p3)
}
 0x192   : > { %s1553_s21 = smov 128   ;;  %s1554_s23 = smov 8  }
 0x193   : > { %1180 = dma.vmem_to_hbm [thread:$0]  (%p2081_p1), %s1950_s22, 4096, %s1948_s8, %s1962_s26, %s1553_s21, %s1553_s21, %s1554_s23  }
 0x194 PF: > { %p1194_p9 = scmp.ge.s32.totalorder %s1546_s25, 2  ;;  %s921_s24 = sand.u32 1, %s1494_s12  }
 0x195   : > { %p2082_p2 = scmp.ne.s32.totalorder %s2074_s0, 0  ;;  %s922_s5 = scalar_lea.sflag [#allocation4], %s921_s24 }
 0x197   : > { %p1190_p6 = pnand %p1194_p9, %p2082_p2 }
 0x199   : > { %1489 = dma.done.wait (!%p1190_p6), %s922_s5, 4096  }
 0x19a   : > { %1491 = vsyncadd (!%p1190_p6), %s922_s5, 4294963200  ;;  %s22_s25 = sadd.s32 1, %s1546_s25   ;;  %s2084_s6 = sld [smem:[#allocation14_spill]] }
 0x19b   : > { %p1991_p13 = scmp.ge.s32.totalorder %s22_s25, 6   ;;  %s2085_s21 = sld [smem:[#allocation11_spill]] }
 0x19c   : > { %s2086_s22 = sld [smem:[#allocation12_spill]]  ;;  %s2087_s23 = sld [smem:[#allocation13_spill]] }
 0x19d   : > { %s2088_s24 = sld [smem:[#allocation15_spill]]  ;;  %s2089_s12 = smov %s1498_s13 }
 0x19e   : > { %s2090_s13 = smov %s1502_s14  ;;  %s2091_s14 = smov %s1777_s4 }
 0x19f   : > { %s2092_s15 = smov %s1510_s16  ;;  %s2093_s16 = smov %s1514_s17 }
 0x1a0   : > { %s2094_s17 = smov %s1774_s11  ;;  %s2095_s18 = smov %s1522_s19 }
 0x1a1   : > { %s2096_s19 = smov %s1526_s20  ;;  %s2097_s20 = smov %s2084_s6 }
 0x1a2   :  { %21 = sbr.rel (!%p1991_p13) target bundleno = 14 (0xe), region = 101 }
 0x1a9   :  { %927 = vsyncpa [#allocation3], 1 }
 0x1aa   :  { %929 = vsyncpa [#allocation3 + $0x1], 1 }
 0x1ab   :  { %930 = vsyncpa [#allocation6], 1 }
 0x1ac   :  { %932 = vsyncpa [#allocation6 + $0x1], 1 }
 0x1ad   :  { %933 = vsyncpa [#allocation4], 1 }
 0x1ae   :  { %935 = vsyncpa [#allocation4 + $0x1], 1 }

</bundles_post_ra>
